<compile_context>
chip_gen: v6e
topology: v6e:2x2x1
jax: 0.10.0
libtpu: 0.0.40
codegen_flags: <defaults>
</compile_context>

<pallas_src>
import jax
import jax.numpy as jnp
from jax.experimental import pallas as pl
from jax.experimental.pallas import tpu as pltpu

BN_EPS = 1e-5
_ROW_ALIGN = 16            # bf16 sublane packing
_DEFAULT_TILE_M = 2048     # rows per grid step (review: 2048-4096 on v6e)
_TILE_BYTE_BUDGET = 24 << 20


def _round_up(x, m):
    return ((x + m - 1) // m) * m


def _vmem_cap_bytes():
    """Per-generation scoped-VMEM ceiling (leave headroom below physical)."""
    try:
        kind = jax.devices()[0].device_kind.lower()
    except Exception:
        kind = ""
    if "v5" in kind or "v6" in kind:
        return 96 << 20        # 128 MiB physical VMEM on v5e / v6e
    return 48 << 20            # v7x: 64 MiB physical -> keep compiler-scratch headroom


def _pick_tile_m(requested, c_in2, c_out, m_rows):
    # Per-row bytes of the double-buffered working set (bf16 activation stream,
    # f32 output stream, f32 matmul temporary).
    per_row = 2 * c_in2 * 2 * 2 + c_out * 4 * 2 + c_out * 4
    cap_rows = max(256, (_TILE_BYTE_BUDGET // per_row) // 128 * 128)
    tm = min(requested, cap_rows, _round_up(m_rows, _ROW_ALIGN))
    return max(_ROW_ALIGN, tm)


def _vmem_limit_bytes(tile_m, c_in2, c_out):
    ab = 2 * tile_m * c_in2 * 2           # bf16 activation stream x double buffer
    out = 2 * tile_m * c_out * 4          # f32 output stream x double buffer
    wts = 2 * c_in2 * c_out * 2           # resident fused weight (x2 buffers)
    tmp = tile_m * c_out * 4              # f32 matmul result temporary
    vecs = 8 * c_out * 4                  # scale / shift / stats rows
    est = int(1.5 * (ab + out + wts + tmp + vecs)) + (4 << 20)
    return max(16 << 20, min(est, _vmem_cap_bytes()))


# ---------------------------------------------------------------------------
# Pass 1: per-channel sum / sum-of-squares of y = [xa | xb] @ blockdiag(W1,W2)
# ---------------------------------------------------------------------------
def _stats_kernel(ab_ref, w_ref, stats_ref):
    @pl.when(pl.program_id(1) == 0)
    def _():
        stats_ref[...] = jnp.zeros_like(stats_ref)

    y = jnp.dot(ab_ref[...], w_ref[...], preferred_element_type=jnp.float32)
    s = jnp.sum(y, axis=0, keepdims=True)          # (1, C_out)
    q = jnp.sum(y * y, axis=0, keepdims=True)      # (1, C_out)
    stats_ref[...] += jnp.concatenate([s, q], axis=0)   # single (2, C_out) store


# ---------------------------------------------------------------------------
# Pass 2: recompute the fused matmul, apply folded BN scale/shift, full-width
# lane-dense store of the whole (tile_m, C_out) block.
# ---------------------------------------------------------------------------
def _normalize_kernel(ab_ref, w_ref, scale_ref, shift_ref, o_ref):
    y = jnp.dot(ab_ref[...], w_ref[...], preferred_element_type=jnp.float32)
    o_ref[...] = (y * scale_ref[...] + shift_ref[...]).astype(o_ref.dtype)


def factorized_reduce(x, w1, w2, gamma, beta, *, tile_m=_DEFAULT_TILE_M):
    """x: (N, C_in, H, W) f32 NCHW.  w1/w2: (C_half, C_in, 1, 1).
    gamma/beta: (C_out,).  Returns (N, C_out, H//2, W//2) f32 NCHW."""
    N, C_in, H, W = x.shape
    assert H % 2 == 0 and W % 2 == 0, (
        "FactorizedReduce kernel matches PyTorch stride-2 semantics only for "
        "even spatial sizes.")
    C_half = w1.shape[0]
    C_out = 2 * C_half
    Ho, Wo = H // 2, W // 2
    M = N * Ho * Wo
    C_in2 = 2 * C_in

    # -- Single fused relayout: relu + stride-2 gather + channel concat +
    #    bf16 cast + channels-last flatten (x read once, one bf16 stream).
    # TODO(synk): keep the surrounding model NHWC so this gather/transpose and
    #    the final NCHW transpose disappear entirely; they are PyTorch parity glue.
    xab = jnp.concatenate([x[:, :, ::2, ::2], x[:, :, 1::2, 1::2]], axis=1)
    xab = jnp.maximum(xab, 0.0).astype(jnp.bfloat16)            # hoisted ReLU
    xab = jnp.transpose(xab, (0, 2, 3, 1)).reshape(M, C_in2)

    # -- Block-diagonal fused weight: [xa | xb] @ blockdiag(W1, W2) = [y1 | y2].
    w1m = jnp.transpose(w1.reshape(C_half, C_in), (1, 0))
    w2m = jnp.transpose(w2.reshape(C_half, C_in), (1, 0))
    w_fused = jnp.zeros((C_in2, C_out), jnp.float32)
    w_fused = w_fused.at[:C_in, :C_half].set(w1m)
    w_fused = w_fused.at[C_in:, C_half:].set(w2m)
    w_fused = w_fused.astype(jnp.bfloat16)
    # TODO(synk): on v5e, split the fused matmul into two K<=128 chunks when
    #    2*C_in > 128 (v5e MXU is 4x128^2).

    gamma = gamma.astype(jnp.float32)
    beta = beta.astype(jnp.float32)

    # -- Row tiling (zero pad rows: ReLU already applied, pads contribute 0). --
    tile_m = _pick_tile_m(tile_m, C_in2, C_out, M)
    M_pad = _round_up(M, tile_m)
    n_tiles = M_pad // tile_m
    n_core = 2 if n_tiles >= 2 else 1          # v7x megacore split for pass 1
    if n_tiles % n_core:
        n_tiles += 1
        M_pad = n_tiles * tile_m
    if M_pad != M:
        xab = jnp.pad(xab, ((0, M_pad - M), (0, 0)))
    tiles_per_core = n_tiles // n_core
    vmem_bytes = _vmem_limit_bytes(tile_m, C_in2, C_out)

    # -- Pass 1: per-core partial per-channel statistics. ----------------------
    row_spec2 = pl.BlockSpec((tile_m, C_in2),
                             lambda c, i: (c * tiles_per_core + i, 0))
    w_spec2 = pl.BlockSpec((C_in2, C_out), lambda c, i: (0, 0))      # resident

    stats = pl.pallas_call(
        _stats_kernel,
        out_shape=jax.ShapeDtypeStruct((n_core, 2, C_out), jnp.float32),
        grid_spec=pltpu.PrefetchScalarGridSpec(
            num_scalar_prefetch=0,
            grid=(n_core, tiles_per_core),
            in_specs=[row_spec2, w_spec2],
            out_specs=pl.BlockSpec((None, 2, C_out), lambda c, i: (c, 0, 0)),
        ),
        compiler_params=pltpu.CompilerParams(
            dimension_semantics=("parallel", "arbitrary"),
            vmem_limit_bytes=vmem_bytes),
    )(xab, w_fused)

    # -- Fold BN into one scale/shift per channel (train-mode biased variance).
    tot = jnp.sum(stats, axis=0)                 # (2, C_out): [sum, sum-of-sq]
    inv_m = 1.0 / float(M)
    mean = tot[0] * inv_m
    var = jnp.maximum(tot[1] * inv_m - mean * mean, 0.0)
    scale_v = gamma * jax.lax.rsqrt(var + BN_EPS)
    shift_v = beta - mean * scale_v
    scale = scale_v.reshape(1, C_out)
    shift = shift_v.reshape(1, C_out)

    # -- Pass 2: normalize (recompute cheap matmul, one FMA per element). ------
    row_spec1 = pl.BlockSpec((tile_m, C_in2), lambda i: (i, 0))
    w_spec1 = pl.BlockSpec((C_in2, C_out), lambda i: (0, 0))         # resident
    vec_spec1 = pl.BlockSpec((1, C_out), lambda i: (0, 0))           # resident

    out_flat = pl.pallas_call(
        _normalize_kernel,
        out_shape=jax.ShapeDtypeStruct((M_pad, C_out), jnp.float32),
        grid_spec=pltpu.PrefetchScalarGridSpec(
            num_scalar_prefetch=0,
            grid=(n_tiles,),
            in_specs=[row_spec1, w_spec1, vec_spec1, vec_spec1],
            out_specs=pl.BlockSpec((tile_m, C_out), lambda i: (i, 0)),
        ),
        compiler_params=pltpu.CompilerParams(
            dimension_semantics=("parallel",),       # megacore on v7x
            vmem_limit_bytes=vmem_bytes),
    )(xab, w_fused, scale, shift)
    # TODO(synk): emit bf16 here (halves the dominant HBM write of the
    #    mem-bound pass) if downstream consumers tolerate it; kept f32 for parity.

    # (M, C_out) -> NHWC (free reshape) -> NCHW (PyTorch parity glue).
    out = out_flat[:M].reshape(N, Ho, Wo, C_out)
    return jnp.transpose(out, (0, 3, 1, 2))


# ---------------------------------------------------------------------------
# Plain-JAX references (PyTorch forward, train-mode BN)
# ---------------------------------------------------------------------------
def _reference(x, w1, w2, gamma, beta, matmul_dtype=jnp.float32):
    xr = jnp.maximum(x, 0.0)
    C_half, C_in = w1.shape[0], w1.shape[1]

    def conv1x1_s2(inp, w):  # inp NCHW, w (Co, Ci, 1, 1)
        strided = inp[:, :, ::2, ::2].astype(matmul_dtype)
        wm = w.reshape(C_half, C_in).astype(matmul_dtype)
        return jnp.einsum('nchw,oc->nohw', strided, wm,
                          preferred_element_type=jnp.float32)

    y1 = conv1x1_s2(xr, w1)
    y2 = conv1x1_s2(xr[:, :, 1:, 1:], w2)
    y = jnp.concatenate([y1, y2], axis=1)
    mean = jnp.mean(y, axis=(0, 2, 3), keepdims=True)
    var = jnp.mean((y - mean) ** 2, axis=(0, 2, 3), keepdims=True)
    yhat = (y - mean) / jnp.sqrt(var + BN_EPS)
    return yhat * gamma.reshape(1, -1, 1, 1) + beta.reshape(1, -1, 1, 1)


if __name__ == "__main__":
    key = jax.random.PRNGKey(0)
    k_x, k_w1, k_w2, k_g, k_b = jax.random.split(key, 5)

    N, C_in, H, W = 2, 4, 16, 16
    C_out = 8
    C_half = C_out // 2

    x = jax.random.normal(k_x, (N, C_in, H, W), dtype=jnp.float32)
    w1 = jax.random.normal(k_w1, (C_half, C_in, 1, 1), dtype=jnp.float32) * 0.1
    w2 = jax.random.normal(k_w2, (C_half, C_in, 1, 1), dtype=jnp.float32) * 0.1
    gamma = 1.0 + 0.1 * jax.random.normal(k_g, (C_out,), dtype=jnp.float32)
    beta = 0.1 * jax.random.normal(k_b, (C_out,), dtype=jnp.float32)

    fr = jax.jit(factorized_reduce)
    out = jax.block_until_ready(fr(x, w1, w2, gamma, beta))
    assert out.shape == (N, C_out, H // 2, W // 2), out.shape

    # Exact-semantics check vs a reference that also uses bf16 matmul operands.
    ref_bf16 = _reference(x, w1, w2, gamma, beta, matmul_dtype=jnp.bfloat16)
    err_bf16 = float(jnp.max(jnp.abs(out - ref_bf16)))
    assert jnp.allclose(out, ref_bf16, atol=1e-3, rtol=1e-3), err_bf16

    # Sanity check vs the pure-f32 PyTorch-style reference (bf16 matmul noise).
    ref_f32 = _reference(x, w1, w2, gamma, beta, matmul_dtype=jnp.float32)
    err_f32 = float(jnp.max(jnp.abs(out - ref_f32)))
    assert jnp.allclose(out, ref_f32, atol=5e-2, rtol=5e-2), err_f32

    print("KERNEL_OK")
</pallas_src>

<mosaic_0001>
module attributes {stable_mosaic.version = 11 : i64} {
  func.func @_stats_kernel(%arg0: i32, %arg1: i32, %arg2: memref<128x8xbf16, #tpu.memory_space<vmem>>, %arg3: memref<8x8xbf16, #tpu.memory_space<vmem>>, %arg4: memref<1x2x8xf32, #tpu.memory_space<vmem>>) attributes {dimension_semantics = [#tpu.dimension_semantics<parallel>, #tpu.dimension_semantics<arbitrary>], iteration_bounds = array<i64: 1, 1>, scalar_prefetch = 0 : i64, scratch_operands = 0 : i64, tpu.core_type = #tpu.core_type<tc>, window_params = [{transform_indices = @transform_0, window_bounds = array<i64: 128, 8>}, {pipeline_mode = #tpu.pipeline_mode<synchronous>, transform_indices = @transform_1, window_bounds = array<i64: 8, 8>}, {transform_indices = @transform_2, window_bounds = array<i64: 1, 2, 8>}]} {
    %c0_i32 = arith.constant 0 : i32
    %0 = arith.cmpi eq, %arg1, %c0_i32 : i32
    %1 = arith.extui %0 : i1 to i32
    %c0_i32_0 = arith.constant 0 : i32
    %2 = arith.cmpi ne, %1, %c0_i32_0 : i32
    scf.if %2 {
      %cst_12 = arith.constant 0.000000e+00 : f32
      %18 = vector.broadcast %cst_12 : f32 to vector<2x8xf32>
      %c0_13 = arith.constant 0 : index
      %c0_14 = arith.constant 0 : index
      %c0_15 = arith.constant 0 : index
      %19 = vector.load %arg4[%c0_13, %c0_14, %c0_15] : memref<1x2x8xf32, #tpu.memory_space<vmem>>, vector<1x2x8xf32>
      %20 = vector.shape_cast %19 : vector<1x2x8xf32> to vector<2x8xf32>
      %21 = vector.shape_cast %18 : vector<2x8xf32> to vector<1x2x8xf32>
      tpu.vector_store %arg4[%c0_13, %c0_14, %c0_15], %21 {strides = array<i32>} : memref<1x2x8xf32, #tpu.memory_space<vmem>>, vector<1x2x8xf32>,
    } else {
    }
    %c0 = arith.constant 0 : index
    %c0_1 = arith.constant 0 : index
    %3 = vector.load %arg2[%c0, %c0_1] : memref<128x8xbf16, #tpu.memory_space<vmem>>, vector<128x8xbf16>
    %c0_2 = arith.constant 0 : index
    %c0_3 = arith.constant 0 : index
    %4 = vector.load %arg3[%c0_2, %c0_3] : memref<8x8xbf16, #tpu.memory_space<vmem>>, vector<8x8xbf16>
    %cst = arith.constant dense<0.000000e+00> : vector<128x8xf32>
    %5 = tpu.matmul %3, %4, %cst {dimension_numbers = #tpu.dot_dimension_numbers<[1], [0], [0], [1], [0, 0, 1, 1], [], []>} : vector<128x8xbf16>, vector<8x8xbf16>, vector<128x8xf32> -> vector<128x8xf32>
    %cst_4 = arith.constant dense<0.000000e+00> : vector<8xf32>
    %6 = vector.multi_reduction <add>, %5, %cst_4 [0] : vector<128x8xf32> to vector<8xf32>
    %7 = vector.shape_cast %6 : vector<8xf32> to vector<1x8xf32>
    %8 = arith.mulf %5, %5 : vector<128x8xf32>
    %cst_5 = arith.constant dense<0.000000e+00> : vector<8xf32>
    %9 = vector.multi_reduction <add>, %8, %cst_5 [0] : vector<128x8xf32> to vector<8xf32>
    %10 = vector.shape_cast %9 : vector<8xf32> to vector<1x8xf32>
    %c0_6 = arith.constant 0 : index
    %c0_7 = arith.constant 0 : index
    %c0_8 = arith.constant 0 : index
    %11 = vector.load %arg4[%c0_6, %c0_7, %c0_8] : memref<1x2x8xf32, #tpu.memory_space<vmem>>, vector<1x2x8xf32>
    %12 = vector.shape_cast %11 : vector<1x2x8xf32> to vector<2x8xf32>
    %13 = tpu.concatenate %7, %10 in 0 : vector<1x8xf32>, vector<1x8xf32> -> vector<2x8xf32>
    %14 = arith.addf %12, %13 : vector<2x8xf32>
    %c0_9 = arith.constant 0 : index
    %c0_10 = arith.constant 0 : index
    %c0_11 = arith.constant 0 : index
    %15 = vector.load %arg4[%c0_9, %c0_10, %c0_11] : memref<1x2x8xf32, #tpu.memory_space<vmem>>, vector<1x2x8xf32>
    %16 = vector.shape_cast %15 : vector<1x2x8xf32> to vector<2x8xf32>
    %17 = vector.shape_cast %14 : vector<2x8xf32> to vector<1x2x8xf32>
    tpu.vector_store %arg4[%c0_9, %c0_10, %c0_11], %17 {strides = array<i32>} : memref<1x2x8xf32, #tpu.memory_space<vmem>>, vector<1x2x8xf32>,
    return
  }
  func.func @transform_0(%arg0: i32, %arg1: i32) -> (i32, i32) {
    %c1_i32 = arith.constant 1 : i32
    %0 = arith.muli %arg0, %c1_i32 : i32
    %1 = arith.addi %0, %arg1 : i32
    %c0_i32 = arith.constant 0 : i32
    %c0_i32_0 = arith.constant 0 : i32
    return %1, %c0_i32 : i32, i32
  }
  func.func @transform_1(%arg0: i32, %arg1: i32) -> (i32, i32) {
    %c0_i32 = arith.constant 0 : i32
    %c0_i32_0 = arith.constant 0 : i32
    %c0_i32_1 = arith.constant 0 : i32
    return %c0_i32, %c0_i32_0 : i32, i32
  }
  func.func @transform_2(%arg0: i32, %arg1: i32) -> (i32, i32, i32) {
    %c0_i32 = arith.constant 0 : i32
    %c0_i32_0 = arith.constant 0 : i32
    %c0_i32_1 = arith.constant 0 : i32
    return %arg0, %c0_i32, %c0_i32_0 : i32, i32, i32
  }
}

module attributes {stable_mosaic.version = 11 : i64} {
  func.func @_normalize_kernel(%arg0: i32, %arg1: memref<128x8xbf16, #tpu.memory_space<vmem>>, %arg2: memref<8x8xbf16, #tpu.memory_space<vmem>>, %arg3: memref<1x8xf32, #tpu.memory_space<vmem>>, %arg4: memref<1x8xf32, #tpu.memory_space<vmem>>, %arg5: memref<128x8xf32, #tpu.memory_space<vmem>>) attributes {dimension_semantics = [#tpu.dimension_semantics<parallel>], iteration_bounds = array<i64: 1>, scalar_prefetch = 0 : i64, scratch_operands = 0 : i64, tpu.core_type = #tpu.core_type<tc>, window_params = [{transform_indices = @transform_0, window_bounds = array<i64: 128, 8>}, {pipeline_mode = #tpu.pipeline_mode<synchronous>, transform_indices = @transform_1, window_bounds = array<i64: 8, 8>}, {pipeline_mode = #tpu.pipeline_mode<synchronous>, transform_indices = @transform_2, window_bounds = array<i64: 1, 8>}, {pipeline_mode = #tpu.pipeline_mode<synchronous>, transform_indices = @transform_3, window_bounds = array<i64: 1, 8>}, {transform_indices = @transform_4, window_bounds = array<i64: 128, 8>}]} {
    %c0 = arith.constant 0 : index
    %c0_0 = arith.constant 0 : index
    %0 = vector.load %arg1[%c0, %c0_0] : memref<128x8xbf16, #tpu.memory_space<vmem>>, vector<128x8xbf16>
    %c0_1 = arith.constant 0 : index
    %c0_2 = arith.constant 0 : index
    %1 = vector.load %arg2[%c0_1, %c0_2] : memref<8x8xbf16, #tpu.memory_space<vmem>>, vector<8x8xbf16>
    %cst = arith.constant dense<0.000000e+00> : vector<128x8xf32>
    %2 = tpu.matmul %0, %1, %cst {dimension_numbers = #tpu.dot_dimension_numbers<[1], [0], [0], [1], [0, 0, 1, 1], [], []>} : vector<128x8xbf16>, vector<8x8xbf16>, vector<128x8xf32> -> vector<128x8xf32>
    %c0_3 = arith.constant 0 : index
    %c0_4 = arith.constant 0 : index
    %3 = vector.load %arg3[%c0_3, %c0_4] : memref<1x8xf32, #tpu.memory_space<vmem>>, vector<1x8xf32>
    %4 = vector.broadcast %3 : vector<1x8xf32> to vector<128x8xf32>
    %5 = arith.mulf %2, %4 : vector<128x8xf32>
    %c0_5 = arith.constant 0 : index
    %c0_6 = arith.constant 0 : index
    %6 = vector.load %arg4[%c0_5, %c0_6] : memref<1x8xf32, #tpu.memory_space<vmem>>, vector<1x8xf32>
    %7 = vector.broadcast %6 : vector<1x8xf32> to vector<128x8xf32>
    %8 = arith.addf %5, %7 : vector<128x8xf32>
    %c0_7 = arith.constant 0 : index
    %c0_8 = arith.constant 0 : index
    %9 = vector.load %arg5[%c0_7, %c0_8] : memref<128x8xf32, #tpu.memory_space<vmem>>, vector<128x8xf32>
    tpu.vector_store %arg5[%c0_7, %c0_8], %8 {strides = array<i32>} : memref<128x8xf32, #tpu.memory_space<vmem>>, vector<128x8xf32>,
    return
  }
  func.func @transform_0(%arg0: i32) -> (i32, i32) {
    %c0_i32 = arith.constant 0 : i32
    %c0_i32_0 = arith.constant 0 : i32
    return %arg0, %c0_i32 : i32, i32
  }
  func.func @transform_1(%arg0: i32) -> (i32, i32) {
    %c0_i32 = arith.constant 0 : i32
    %c0_i32_0 = arith.constant 0 : i32
    %c0_i32_1 = arith.constant 0 : i32
    return %c0_i32, %c0_i32_0 : i32, i32
  }
  func.func @transform_2(%arg0: i32) -> (i32, i32) {
    %c0_i32 = arith.constant 0 : i32
    %c0_i32_0 = arith.constant 0 : i32
    %c0_i32_1 = arith.constant 0 : i32
    return %c0_i32, %c0_i32_0 : i32, i32
  }
  func.func @transform_3(%arg0: i32) -> (i32, i32) {
    %c0_i32 = arith.constant 0 : i32
    %c0_i32_0 = arith.constant 0 : i32
    %c0_i32_1 = arith.constant 0 : i32
    return %c0_i32, %c0_i32_0 : i32, i32
  }
  func.func @transform_4(%arg0: i32) -> (i32, i32) {
    %c0_i32 = arith.constant 0 : i32
    %c0_i32_0 = arith.constant 0 : i32
    return %arg0, %c0_i32 : i32, i32
  }
}

</mosaic_0001>

<bundles_post_ra>
// kernel: factorized_reduce.2
= control target key start
LH: loop header
LB: loop body
LE: loop exit
PB: predicated region body
PF: predicated region fallthrough
CT: control target
= control target key end

     0   :  { %vm122_vm0 = vcmask 1043456   ;;  %vm97_vm1 = vcmask 64512   ;;  %vm38_vm2 = vcmask 58368   ;;  %v385_v10 = vmov 0.0   ;;  %s479_s1 = inlined_call_operand.vmem [shape: bf16[8,8], index: 1, kind: input, shape index: {}]   ;;  %s480_s0 = inlined_call_operand.vmem [shape: bf16[128,8], index: 0, kind: input, shape index: {}]   ;;  %s481_s2 = inlined_call_operand.vmem [shape: f32[1,2,8], index: 2, kind: output, shape index: {}]  }
   0x1   :  { %v56_v0 = vld [vmem:[%s479_s1] sm:$0xf]  ;;  %v378_v3 = vld [vmem:[%s480_s0 + $0x8] sm:$0xff]   ;;  %v379_v4 = vld [vmem:[%s480_s0 + $0x10] sm:$0xff]   ;;  %39 = vst.msk [vmem:[%s481_s2] sm:$0x3] %vm38_vm2, %v385_v10 }
   0x2   :  { %374 = vmatprep.subr.msk.bf16.mxu0 %vm122_vm0, %v56_v0  ;;  %v124_v1 = vsel %vm122_vm0, %v56_v0, 0  ;;  %v377_v2 = vld [vmem:[%s480_s0] sm:$0xff]   ;;  %375 = vmatprep.subr.msk.bf16.mxu1 %vm122_vm0, %v56_v0  ;;  %v382_v6 = vld [vmem:[%s480_s0 + $0x28] sm:$0xff]   ;;  %v383_v7 = vld [vmem:[%s480_s0 + $0x30] sm:$0xff]   ;;  %vm314_vm3 = vcmask 1040384  }
   0x3   :  { %355 = vmatpush3.bf16.msra.mxu0 %v124_v1  ;;  %373 = vmatpush3.bf16.msra.mxu1 %v124_v1  ;;  %v381_v5 = vld [vmem:[%s480_s0 + $0x20] sm:$0xff]   ;;  %v380_v8 = vld [vmem:[%s480_s0 + $0x18] sm:$0xff]  }
   0x4   :  { %356 = vmatprep.mubr.msk.bf16.mxu0 %vm97_vm1, %v377_v2  ;;  %364 = vmatprep.mubr.msk.bf16.mxu1 %vm97_vm1, %v381_v5  ;;  %v384_v9 = vld [vmem:[%s480_s0 + $0x38] sm:$0xff]  }
   0x6   :  { %357 = vmatmul.mubr.msk.bf16.vlgmr.msra.gmra.mxu0 %vm97_vm1, %v378_v3  ;;  %365 = vmatmul.mubr.msk.bf16.vlgmr.msra.gmra.mxu1 %vm97_vm1, %v382_v6 }
   0x7   :  { %360 = vmatprep.mubr.msk.bf16.mxu0 %vm97_vm1, %v379_v4  ;;  %368 = vmatprep.mubr.msk.bf16.mxu1 %vm97_vm1, %v383_v7 }
   0xe   :  { %361 = vmatmul.mubr.msk.bf16.gmra.mxu0 %vm97_vm1, %v380_v8  ;;  %369 = vmatmul.mubr.msk.bf16.gmra.mxu1 %vm97_vm1, %v384_v9 }
  0xc6   :  { %v358_v11 = vpop.f32.mrf.mxu0  ;;  %v366_v13 = vpop.f32.mrf.mxu1 }
  0xc7   :  { %v262_v18 = vmul.f32 %v358_v11, %v358_v11  ;;  %v226_v25 = vsel %vm97_vm1, %v358_v11, 0.0  ;;  %v270_v4 = vmul.f32 %v366_v13, %v366_v13  ;;  %v242_v9 = vsel %vm97_vm1, %v366_v13, 0.0 }
  0xc8   :  { %v160_v12 = vpop.f32.mrf.mxu0  ;;  %v192_v16 = vpop.f32.mrf.mxu1 }
  0xc9   :  { %v260_v15 = vmul.f32 %v160_v12, %v160_v12  ;;  %v223_v19 = vsel %vm97_vm1, %v160_v12, 0.0  ;;  %v279_v33 = vsel %vm97_vm1, %v262_v18, 0.0  ;;  %v268_v59 = vmul.f32 %v192_v16, %v192_v16 }
  0xca   :  { %v359_v14 = vpop.f32.mrf.mxu0  ;;  %v367_v22 = vpop.f32.mrf.mxu1  ;;  %v238_v63 = vsel %vm97_vm1, %v192_v16, 0.0  ;;  %v295_v16 = vsel %vm97_vm1, %v270_v4, 0.0 }
  0xcb   :  { %v276_v26 = vsel %vm97_vm1, %v260_v15, 0.0  ;;  %v263_v27 = vmul.f32 %v359_v14, %v359_v14  ;;  %v228_v34 = vsel %vm97_vm1, %v359_v14, 0.0  ;;  %v291_v5 = vsel %vm97_vm1, %v268_v59, 0.0 }
  0xcc   :  { %v163_v17 = vpop.f32.mrf.mxu0  ;;  %v195_v32 = vpop.f32.mrf.mxu1  ;;  %v271_v10 = vmul.f32 %v367_v22, %v367_v22 }
  0xcd   :  { %v224_v20 = vsel %vm97_vm1, %v163_v17, 0.0  ;;  %v261_v21 = vmul.f32 %v163_v17, %v163_v17  ;;  %v281_v39 = vsel %vm97_vm1, %v263_v27, 0.0  ;;  %v269_v0 = vmul.f32 %v195_v32, %v195_v32 }
  0xce   :  { %v225_v23 = vadd.f32 %v224_v20, %v223_v19  ;;  %v362_v24 = vpop.f32.mrf.mxu0  ;;  %v370_v44 = vpop.f32.mrf.mxu1  ;;  %v240_v6 = vsel %vm97_vm1, %v195_v32, 0.0  ;;  %v244_v17 = vsel %vm97_vm1, %v367_v22, 0.0 }
  0xcf   :  { %v277_v28 = vsel %vm97_vm1, %v261_v21, 0.0  ;;  %v266_v45 = vmul.f32 %v362_v24, %v362_v24  ;;  %v234_v51 = vsel %vm97_vm1, %v362_v24, 0.0  ;;  %v293_v11 = vsel %vm97_vm1, %v269_v0, 0.0 }
  0xd0   :  { %v227_v29 = vadd.f32 %v226_v25, %v225_v23  ;;  %v278_v30 = vadd.f32 %v277_v28, %v276_v26  ;;  %v176_v31 = vpop.f32.mrf.mxu0  ;;  %v208_v56 = vpop.f32.mrf.mxu1  ;;  %v297_v21 = vsel %vm97_vm1, %v271_v10, 0.0  ;;  %v274_v26 = vmul.f32 %v370_v44, %v370_v44 }
  0xd1   :  { %v264_v35 = vmul.f32 %v176_v31, %v176_v31  ;;  %v230_v40 = vsel %vm97_vm1, %v176_v31, 0.0  ;;  %v287_v57 = vsel %vm97_vm1, %v266_v45, 0.0  ;;  %v272_v18 = vmul.f32 %v208_v56, %v208_v56 }
  0xd2   :  { %v280_v36 = vadd.f32 %v279_v33, %v278_v30  ;;  %v229_v37 = vadd.f32 %v228_v34, %v227_v29  ;;  %v363_v38 = vpop.f32.mrf.mxu0  ;;  %v371_v3 = vpop.f32.mrf.mxu1  ;;  %v246_v23 = vsel %vm97_vm1, %v208_v56, 0.0  ;;  %v250_v31 = vsel %vm97_vm1, %v370_v44, 0.0 }
  0xd3   :  { %v283_v46 = vsel %vm97_vm1, %v264_v35, 0.0  ;;  %v267_v52 = vmul.f32 %v363_v38, %v363_v38  ;;  %v236_v58 = vsel %vm97_vm1, %v363_v38, 0.0  ;;  %v299_v27 = vsel %vm97_vm1, %v272_v18, 0.0 }
  0xd4   :  { %v231_v41 = vadd.f32 %v230_v40, %v229_v37  ;;  %v282_v42 = vadd.f32 %v281_v39, %v280_v36  ;;  %v179_v43 = vpop.f32.mrf.mxu0  ;;  %v211_v15 = vpop.f32.mrf.mxu1  ;;  %v275_v22 = vmul.f32 %v371_v3, %v371_v3  ;;  %v303_v35 = vsel %vm97_vm1, %v274_v26, 0.0 }
  0xd5   :  { %v232_v47 = vsel %vm97_vm1, %v179_v43, 0.0  ;;  %v265_v48 = vmul.f32 %v179_v43, %v179_v43  ;;  %v289_v62 = vsel %vm97_vm1, %v267_v52, 0.0  ;;  %v273_v24 = vmul.f32 %v211_v15, %v211_v15 }
  0xd6   :  { %v284_v49 = vadd.f32 %v283_v46, %v282_v42  ;;  %v233_v50 = vadd.f32 %v232_v47, %v231_v41  ;;  %v248_v28 = vsel %vm97_vm1, %v211_v15, 0.0  ;;  %v252_v36 = vsel %vm97_vm1, %v371_v3, 0.0 }
  0xd7   :  { %v285_v53 = vsel %vm97_vm1, %v265_v48, 0.0  ;;  %v301_v32 = vsel %vm97_vm1, %v273_v24, 0.0  ;;  %v305_v39 = vsel %vm97_vm1, %v275_v22, 0.0 }
  0xd8   :  { %v235_v54 = vadd.f32 %v234_v51, %v233_v50  ;;  %v286_v55 = vadd.f32 %v285_v53, %v284_v49  ;;  %v313_v53 = vld [vmem:[%s481_s2] sm:$0x3] }
  0xda   :  { %v237_v60 = vadd.f32 %v236_v58, %v235_v54  ;;  %v288_v61 = vadd.f32 %v287_v57, %v286_v55 }
  0xdc   :  { %v290_v1 = vadd.f32 %v289_v62, %v288_v61  ;;  %v239_v2 = vadd.f32 %v238_v63, %v237_v60 }
  0xde   :  { %v241_v7 = vadd.f32 %v240_v6, %v239_v2  ;;  %v292_v8 = vadd.f32 %v291_v5, %v290_v1 }
  0xe0   :  { %v243_v12 = vadd.f32 %v242_v9, %v241_v7  ;;  %v294_v14 = vadd.f32 %v293_v11, %v292_v8 }
  0xe2   :  { %v296_v19 = vadd.f32 %v295_v16, %v294_v14  ;;  %v245_v20 = vadd.f32 %v244_v17, %v243_v12 }
  0xe4   :  { %v247_v25 = vadd.f32 %v246_v23, %v245_v20  ;;  %v298_v13 = vadd.f32 %v297_v21, %v296_v19 }
  0xe6   :  { %v300_v29 = vadd.f32 %v299_v27, %v298_v13  ;;  %v249_v30 = vadd.f32 %v248_v28, %v247_v25 }
  0xe8   :  { %v251_v33 = vadd.f32 %v250_v31, %v249_v30  ;;  %v302_v34 = vadd.f32 %v301_v32, %v300_v29 }
  0xea   :  { %v253_v37 = vadd.f32 %v252_v36, %v251_v33  ;;  %v304_v38 = vadd.f32 %v303_v35, %v302_v34 }
  0xec   :  { %v254_v40 = vrot.slane %v253_v37, 4  ;;  %v306_v41 = vadd.f32 %v305_v39, %v304_v38 }
  0xee   :  { %v255_v42 = vadd.f32 %v254_v40, %v253_v37  ;;  %v307_v43 = vrot.slane %v306_v41, 4 }
  0xf0   :  { %v256_v45 = vrot.slane %v255_v42, 2  ;;  %v308_v46 = vadd.f32 %v307_v43, %v306_v41 }
  0xf2   :  { %v257_v44 = vadd.f32 %v256_v45, %v255_v42  ;;  %v309_v47 = vrot.slane %v308_v46, 2 }
  0xf4   :  { %v258_v48 = vrot.slane %v257_v44, 1  ;;  %v310_v49 = vadd.f32 %v309_v47, %v308_v46 }
  0xf6   :  { %v311_v50 = vrot.slane %v310_v49, 1  ;;  %v259_v51 = vadd.f32 %v258_v48, %v257_v44 }
  0xf8   :  { %v312_v52 = vadd.f32 %v311_v50, %v310_v49 }
  0xfa   :  { %v315_v54 = vsel %vm314_vm3, %v259_v51, %v312_v52 }
  0xfb   :  { %v316_v55 = vadd.f32 %v315_v54, %v313_v53 }
  0xfd   :  { %318 = vst.msk [vmem:[%s481_s2] sm:$0x3] %vm38_vm2, %v316_v55 }

// kernel: factorized_reduce.3
= control target key start
LH: loop header
LB: loop body
LE: loop exit
PB: predicated region body
PF: predicated region fallthrough
CT: control target
= control target key end

     0   :  { %vm100_vm0 = vcmask 1043456   ;;  %vm75_vm1 = vcmask 64512   ;;  %s454_s1 = inlined_call_operand.vmem [shape: bf16[8,8], index: 1, kind: input, shape index: {}]   ;;  %s455_s0 = inlined_call_operand.vmem [shape: bf16[128,8], index: 0, kind: input, shape index: {}]   ;;  %s456_s2 = inlined_call_operand.vmem [shape: f32[1,8], index: 2, kind: input, shape index: {}]   ;;  %s457_s3 = inlined_call_operand.vmem [shape: f32[1,8], index: 3, kind: input, shape index: {}]   ;;  %s458_s4 = inlined_call_operand.vmem [shape: f32[128,8], index: 4, kind: output, shape index: {}]  }
   0x1   :  { %v34_v0 = vld [vmem:[%s454_s1] sm:$0xf]  ;;  %v318_v4 = vld [vmem:[%s455_s0 + $0x8] sm:$0xff]   ;;  %v320_v6 = vld [vmem:[%s455_s0 + $0x10] sm:$0xff]  }
   0x2   :  { %314 = vmatprep.subr.msk.bf16.mxu0 %vm100_vm0, %v34_v0  ;;  %315 = vmatprep.subr.msk.bf16.mxu1 %vm100_vm0, %v34_v0  ;;  %v102_v1 = vsel %vm100_vm0, %v34_v0, 0  ;;  %v316_v2 = vld [vmem:[%s455_s0] sm:$0xff]   ;;  %v319_v5 = vld [vmem:[%s455_s0 + $0x28] sm:$0xff]   ;;  %v321_v7 = vld [vmem:[%s455_s0 + $0x30] sm:$0xff]  }
   0x3   :  { %295 = vmatpush3.bf16.msra.mxu0 %v102_v1  ;;  %313 = vmatpush3.bf16.msra.mxu1 %v102_v1  ;;  %v317_v3 = vld [vmem:[%s455_s0 + $0x20] sm:$0xff]   ;;  %v322_v8 = vld [vmem:[%s455_s0 + $0x18] sm:$0xff]  }
   0x4   :  { %296 = vmatprep.mubr.msk.bf16.mxu0 %vm75_vm1, %v316_v2  ;;  %304 = vmatprep.mubr.msk.bf16.mxu1 %vm75_vm1, %v317_v3  ;;  %v323_v9 = vld [vmem:[%s455_s0 + $0x38] sm:$0xff]   ;;  %v283_v10 = vld [vmem:[%s456_s2] ss:$0 sm:$0xff] }
   0x5   :  { %v284_v12 = vld [vmem:[%s457_s3] ss:$0 sm:$0xff] }
   0x6   :  { %297 = vmatmul.mubr.msk.bf16.vlgmr.msra.gmra.mxu0 %vm75_vm1, %v318_v4  ;;  %305 = vmatmul.mubr.msk.bf16.vlgmr.msra.gmra.mxu1 %vm75_vm1, %v319_v5 }
   0x7   :  { %300 = vmatprep.mubr.msk.bf16.mxu0 %vm75_vm1, %v320_v6  ;;  %308 = vmatprep.mubr.msk.bf16.mxu1 %vm75_vm1, %v321_v7 }
   0xe   :  { %301 = vmatmul.mubr.msk.bf16.gmra.mxu0 %vm75_vm1, %v322_v8  ;;  %309 = vmatmul.mubr.msk.bf16.gmra.mxu1 %vm75_vm1, %v323_v9 }
  0xc6   :  { %v298_v11 = vpop.f32.mrf.mxu0  ;;  %v306_v14 = vpop.f32.mrf.mxu1 }
  0xc7   :  { %v210_v13 = vmul.f32 %v298_v11, %v283_v10  ;;  %v218_v15 = vmul.f32 %v306_v14, %v283_v10 }
  0xc8   :  { %v138_v16 = vpop.f32.mrf.mxu0  ;;  %v170_v19 = vpop.f32.mrf.mxu1 }
  0xc9   :  { %v233_v17 = vadd.f32 %v284_v12, %v210_v13  ;;  %v208_v18 = vmul.f32 %v283_v10, %v138_v16  ;;  %v241_v20 = vadd.f32 %v284_v12, %v218_v15  ;;  %v216_v21 = vmul.f32 %v283_v10, %v170_v19 }
  0xca   :  { %v299_v22 = vpop.f32.mrf.mxu0  ;;  %v307_v25 = vpop.f32.mrf.mxu1 }
  0xcb   :  { %249 = vst.msk [vmem:[%s458_s4 + $0x10] sm:$0xff] %vm75_vm1, %v233_v17  ;;  %v231_v23 = vadd.f32 %v284_v12, %v208_v18  ;;  %v211_v24 = vmul.f32 %v299_v22, %v283_v10  ;;  %257 = vst.msk [vmem:[%s458_s4 + $0x50] sm:$0xff] %vm75_vm1, %v241_v20  ;;  %v239_v26 = vadd.f32 %v284_v12, %v216_v21 }
  0xcc   :  { %v219_v27 = vmul.f32 %v307_v25, %v283_v10  ;;  %v141_v28 = vpop.f32.mrf.mxu0  ;;  %v173_v31 = vpop.f32.mrf.mxu1 }
  0xcd   :  { %247 = vst.msk [vmem:[%s458_s4] sm:$0xff] %vm75_vm1, %v231_v23  ;;  %v234_v29 = vadd.f32 %v284_v12, %v211_v24  ;;  %v209_v30 = vmul.f32 %v283_v10, %v141_v28  ;;  %255 = vst.msk [vmem:[%s458_s4 + $0x40] sm:$0xff] %vm75_vm1, %v239_v26  ;;  %v217_v33 = vmul.f32 %v283_v10, %v173_v31 }
  0xce   :  { %v242_v32 = vadd.f32 %v284_v12, %v219_v27  ;;  %v302_v34 = vpop.f32.mrf.mxu0  ;;  %v310_v37 = vpop.f32.mrf.mxu1 }
  0xcf   :  { %250 = vst.msk [vmem:[%s458_s4 + $0x18] sm:$0xff] %vm75_vm1, %v234_v29  ;;  %v232_v35 = vadd.f32 %v284_v12, %v209_v30  ;;  %v214_v36 = vmul.f32 %v302_v34, %v283_v10  ;;  %v240_v38 = vadd.f32 %v284_v12, %v217_v33  ;;  %v222_v39 = vmul.f32 %v310_v37, %v283_v10 }
  0xd0   :  { %258 = vst.msk [vmem:[%s458_s4 + $0x58] sm:$0xff] %vm75_vm1, %v242_v32  ;;  %v154_v40 = vpop.f32.mrf.mxu0  ;;  %v186_v43 = vpop.f32.mrf.mxu1 }
  0xd1   :  { %248 = vst.msk [vmem:[%s458_s4 + $0x8] sm:$0xff] %vm75_vm1, %v232_v35  ;;  %v237_v41 = vadd.f32 %v284_v12, %v214_v36  ;;  %v212_v42 = vmul.f32 %v283_v10, %v154_v40  ;;  %256 = vst.msk [vmem:[%s458_s4 + $0x48] sm:$0xff] %vm75_vm1, %v240_v38  ;;  %v245_v44 = vadd.f32 %v284_v12, %v222_v39 }
  0xd2   :  { %v220_v45 = vmul.f32 %v283_v10, %v186_v43  ;;  %v303_v46 = vpop.f32.mrf.mxu0  ;;  %v311_v49 = vpop.f32.mrf.mxu1 }
  0xd3   :  { %253 = vst.msk [vmem:[%s458_s4 + $0x30] sm:$0xff] %vm75_vm1, %v237_v41  ;;  %v235_v47 = vadd.f32 %v284_v12, %v212_v42  ;;  %v215_v48 = vmul.f32 %v303_v46, %v283_v10  ;;  %261 = vst.msk [vmem:[%s458_s4 + $0x70] sm:$0xff] %vm75_vm1, %v245_v44  ;;  %v223_v51 = vmul.f32 %v311_v49, %v283_v10 }
  0xd4   :  { %v243_v50 = vadd.f32 %v284_v12, %v220_v45  ;;  %v157_v52 = vpop.f32.mrf.mxu0  ;;  %v189_v55 = vpop.f32.mrf.mxu1 }
  0xd5   :  { %251 = vst.msk [vmem:[%s458_s4 + $0x20] sm:$0xff] %vm75_vm1, %v235_v47  ;;  %v238_v53 = vadd.f32 %v284_v12, %v215_v48  ;;  %v213_v54 = vmul.f32 %v283_v10, %v157_v52  ;;  %v246_v56 = vadd.f32 %v284_v12, %v223_v51  ;;  %v221_v57 = vmul.f32 %v283_v10, %v189_v55 }
  0xd6   :  { %259 = vst.msk [vmem:[%s458_s4 + $0x60] sm:$0xff] %vm75_vm1, %v243_v50 }
  0xd7   :  { %254 = vst.msk [vmem:[%s458_s4 + $0x38] sm:$0xff] %vm75_vm1, %v238_v53  ;;  %v236_v58 = vadd.f32 %v284_v12, %v213_v54  ;;  %262 = vst.msk [vmem:[%s458_s4 + $0x78] sm:$0xff] %vm75_vm1, %v246_v56  ;;  %v244_v59 = vadd.f32 %v284_v12, %v221_v57 }
  0xd9   :  { %252 = vst.msk [vmem:[%s458_s4 + $0x28] sm:$0xff] %vm75_vm1, %v236_v58  ;;  %260 = vst.msk [vmem:[%s458_s4 + $0x68] sm:$0xff] %vm75_vm1, %v244_v59 }

</bundles_post_ra>
